<compile_context>
chip_gen: v6e
topology: v6e:2x2x1
jax: 0.10.0
libtpu: 0.0.40
codegen_flags: <defaults>
</compile_context>

<pallas_src>
import jax
import jax.numpy as jnp
from jax.experimental import pallas as pl
from jax.experimental.pallas import tpu as pltpu

LATENT_DIM = 100


def _round_up(x, m):
    return (x + m - 1) // m * m


def mlp_kernel(x_ref, w1_ref, b1_ref, w2_ref, b2_ref, w3_ref, b3_ref, o_ref):
    # x_ref: (tile_b, d_in) f32.  Cast x / weights to bf16 in-kernel (VPU has
    # slack; kernel is DMA-read bound), accumulate in f32 on the MXU, keep the
    # bias + ReLU path in f32.
    x = x_ref[...].astype(jnp.bfloat16)

    # fc1 + ReLU
    h1 = jnp.dot(x, w1_ref[...].astype(jnp.bfloat16),
                 preferred_element_type=jnp.float32)
    h1 = jnp.maximum(h1 + b1_ref[...], 0.0)

    # fc2 + ReLU
    h2 = jnp.dot(h1.astype(jnp.bfloat16), w2_ref[...].astype(jnp.bfloat16),
                 preferred_element_type=jnp.float32)
    h2 = jnp.maximum(h2 + b2_ref[...], 0.0)

    # fc3 (no activation)
    out = jnp.dot(h2.astype(jnp.bfloat16), w3_ref[...].astype(jnp.bfloat16),
                  preferred_element_type=jnp.float32)
    o_ref[...] = (out + b3_ref[...]).astype(o_ref.dtype)


def network_forward(x, params, *, max_tile_b=8192):
    w1, b1, w2, b2, w3, b3 = params
    B, d_in = x.shape
    h1_dim, h2_dim, n_out = w1.shape[1], w2.shape[1], w3.shape[1]

    # ---- balanced batch tiling --------------------------------------------
    n_tiles = pl.cdiv(B, max_tile_b)
    if B >= 512:
        # v7x has two TensorCores: give the "parallel" batch axis an even
        # number of >= 2 steps so both cores are used (no-op on v5e/v6e).
        n_tiles = _round_up(max(n_tiles, 2), 2)
    tile_b = _round_up(pl.cdiv(B, n_tiles), 8)      # 8-row sublane alignment
    if tile_b >= B:
        tile_b = B                                  # single full-array block
    grid = (pl.cdiv(B, tile_b),)

    const = lambda i: (0, 0)   # grid-invariant -> weights stay VMEM-resident

    # Advisory cost so XLA can schedule producers/consumers around the call.
    param_bytes = sum(int(p.size) * p.dtype.itemsize for p in params)
    cost = pl.CostEstimate(
        flops=2 * B * (d_in * h1_dim + h1_dim * h2_dim + h2_dim * n_out),
        transcendentals=0,
        bytes_accessed=B * d_in * x.dtype.itemsize + B * n_out * 4 + param_bytes,
    )

    return pl.pallas_call(
        mlp_kernel,
        out_shape=jax.ShapeDtypeStruct((B, n_out), jnp.float32),
        grid=grid,
        in_specs=[
            pl.BlockSpec((tile_b, d_in), lambda i: (i, 0)),   # x: batch-tiled
            pl.BlockSpec(w1.shape, const),                    # w1 (100, 32)
            pl.BlockSpec(b1.shape, const),                    # b1 (1, 32)
            pl.BlockSpec(w2.shape, const),                    # w2 (32, 16)
            pl.BlockSpec(b2.shape, const),                    # b2 (1, 16)
            pl.BlockSpec(w3.shape, const),                    # w3 (16, 2)
            pl.BlockSpec(b3.shape, const),                    # b3 (1, 2)
        ],
        out_specs=pl.BlockSpec((tile_b, n_out), lambda i: (i, 0)),
        compiler_params=pltpu.CompilerParams(
            dimension_semantics=("parallel",),
            vmem_limit_bytes=48 * 1024 * 1024,
        ),
        cost_estimate=cost,
    )(x, w1, b1, w2, b2, w3, b3)


def init_params(key, latent_dim=LATENT_DIM):
    # Deterministic init mimicking PyTorch nn.Linear default
    # (uniform in +/- 1/sqrt(fan_in)); weights stored as (in, out).
    dims = [(latent_dim, 32), (32, 16), (16, 2)]
    params = []
    for i, (fin, fout) in enumerate(dims):
        kw, kb = jax.random.split(jax.random.fold_in(key, i))
        bound = 1.0 / jnp.sqrt(float(fin))
        w = jax.random.uniform(kw, (fin, fout), jnp.float32, -bound, bound)
        b = jax.random.uniform(kb, (1, fout), jnp.float32, -bound, bound)
        params.extend([w, b])
    return tuple(params)


def network_forward_ref(x, params):
    w1, b1, w2, b2, w3, b3 = params
    h = jnp.maximum(x @ w1 + b1, 0.0)
    h = jnp.maximum(h @ w2 + b2, 0.0)
    return h @ w3 + b3


if __name__ == "__main__":
    key = jax.random.PRNGKey(0)
    latent_dim = LATENT_DIM
    batch = 8

    params = init_params(key, latent_dim)
    x = jax.random.normal(jax.random.fold_in(key, 99), (batch, latent_dim),
                          dtype=jnp.float32)

    fwd = jax.jit(network_forward)
    out = jax.block_until_ready(fwd(x, params))

    ref = network_forward_ref(x, params)
    assert out.shape == (batch, 2), out.shape
    # bf16 matmul operands with f32 accumulation -> loosened tolerance.
    assert jnp.allclose(out, ref, atol=5e-2, rtol=5e-2), (
        float(jnp.max(jnp.abs(out - ref))))

    print("KERNEL_OK")
</pallas_src>

<mosaic_0001>
module attributes {stable_mosaic.version = 11 : i64} {
  func.func @mlp_kernel(%arg0: i32, %arg1: memref<8x100xf32, #tpu.memory_space<vmem>>, %arg2: memref<100x32xf32, #tpu.memory_space<vmem>>, %arg3: memref<1x32xf32, #tpu.memory_space<vmem>>, %arg4: memref<32x16xf32, #tpu.memory_space<vmem>>, %arg5: memref<1x16xf32, #tpu.memory_space<vmem>>, %arg6: memref<16x2xf32, #tpu.memory_space<vmem>>, %arg7: memref<1x2xf32, #tpu.memory_space<vmem>>, %arg8: memref<8x2xf32, #tpu.memory_space<vmem>>) attributes {dimension_semantics = [#tpu.dimension_semantics<parallel>], iteration_bounds = array<i64: 1>, scalar_prefetch = 0 : i64, scratch_operands = 0 : i64, tpu.core_type = #tpu.core_type<tc>, window_params = [{transform_indices = @transform_0, window_bounds = array<i64: 8, 100>}, {pipeline_mode = #tpu.pipeline_mode<synchronous>, transform_indices = @transform_1, window_bounds = array<i64: 100, 32>}, {pipeline_mode = #tpu.pipeline_mode<synchronous>, transform_indices = @transform_2, window_bounds = array<i64: 1, 32>}, {pipeline_mode = #tpu.pipeline_mode<synchronous>, transform_indices = @transform_3, window_bounds = array<i64: 32, 16>}, {pipeline_mode = #tpu.pipeline_mode<synchronous>, transform_indices = @transform_4, window_bounds = array<i64: 1, 16>}, {pipeline_mode = #tpu.pipeline_mode<synchronous>, transform_indices = @transform_5, window_bounds = array<i64: 16, 2>}, {pipeline_mode = #tpu.pipeline_mode<synchronous>, transform_indices = @transform_6, window_bounds = array<i64: 1, 2>}, {transform_indices = @transform_7, window_bounds = array<i64: 8, 2>}]} {
    %c0 = arith.constant 0 : index
    %c0_0 = arith.constant 0 : index
    %0 = vector.load %arg1[%c0, %c0_0] : memref<8x100xf32, #tpu.memory_space<vmem>>, vector<8x100xf32>
    %1 = arith.truncf %0 : vector<8x100xf32> to vector<8x100xbf16>
    %c0_1 = arith.constant 0 : index
    %c0_2 = arith.constant 0 : index
    %2 = vector.load %arg2[%c0_1, %c0_2] : memref<100x32xf32, #tpu.memory_space<vmem>>, vector<100x32xf32>
    %3 = arith.truncf %2 : vector<100x32xf32> to vector<100x32xbf16>
    %cst = arith.constant dense<0.000000e+00> : vector<8x32xf32>
    %4 = tpu.matmul %1, %3, %cst {dimension_numbers = #tpu.dot_dimension_numbers<[1], [0], [0], [1], [0, 0, 1, 1], [], []>} : vector<8x100xbf16>, vector<100x32xbf16>, vector<8x32xf32> -> vector<8x32xf32>
    %c0_3 = arith.constant 0 : index
    %c0_4 = arith.constant 0 : index
    %5 = vector.load %arg3[%c0_3, %c0_4] : memref<1x32xf32, #tpu.memory_space<vmem>>, vector<1x32xf32>
    %6 = vector.broadcast %5 : vector<1x32xf32> to vector<8x32xf32>
    %7 = arith.addf %4, %6 : vector<8x32xf32>
    %cst_5 = arith.constant 0.000000e+00 : f32
    %8 = vector.broadcast %cst_5 : f32 to vector<8x32xf32>
    %9 = arith.maximumf %7, %8 : vector<8x32xf32>
    %10 = arith.truncf %9 : vector<8x32xf32> to vector<8x32xbf16>
    %c0_6 = arith.constant 0 : index
    %c0_7 = arith.constant 0 : index
    %11 = vector.load %arg4[%c0_6, %c0_7] : memref<32x16xf32, #tpu.memory_space<vmem>>, vector<32x16xf32>
    %12 = arith.truncf %11 : vector<32x16xf32> to vector<32x16xbf16>
    %cst_8 = arith.constant dense<0.000000e+00> : vector<8x16xf32>
    %13 = tpu.matmul %10, %12, %cst_8 {dimension_numbers = #tpu.dot_dimension_numbers<[1], [0], [0], [1], [0, 0, 1, 1], [], []>} : vector<8x32xbf16>, vector<32x16xbf16>, vector<8x16xf32> -> vector<8x16xf32>
    %c0_9 = arith.constant 0 : index
    %c0_10 = arith.constant 0 : index
    %14 = vector.load %arg5[%c0_9, %c0_10] : memref<1x16xf32, #tpu.memory_space<vmem>>, vector<1x16xf32>
    %15 = vector.broadcast %14 : vector<1x16xf32> to vector<8x16xf32>
    %16 = arith.addf %13, %15 : vector<8x16xf32>
    %cst_11 = arith.constant 0.000000e+00 : f32
    %17 = vector.broadcast %cst_11 : f32 to vector<8x16xf32>
    %18 = arith.maximumf %16, %17 : vector<8x16xf32>
    %19 = arith.truncf %18 : vector<8x16xf32> to vector<8x16xbf16>
    %c0_12 = arith.constant 0 : index
    %c0_13 = arith.constant 0 : index
    %20 = vector.load %arg6[%c0_12, %c0_13] : memref<16x2xf32, #tpu.memory_space<vmem>>, vector<16x2xf32>
    %21 = arith.truncf %20 : vector<16x2xf32> to vector<16x2xbf16>
    %cst_14 = arith.constant dense<0.000000e+00> : vector<8x2xf32>
    %22 = tpu.matmul %19, %21, %cst_14 {dimension_numbers = #tpu.dot_dimension_numbers<[1], [0], [0], [1], [0, 0, 1, 1], [], []>} : vector<8x16xbf16>, vector<16x2xbf16>, vector<8x2xf32> -> vector<8x2xf32>
    %c0_15 = arith.constant 0 : index
    %c0_16 = arith.constant 0 : index
    %23 = vector.load %arg7[%c0_15, %c0_16] : memref<1x2xf32, #tpu.memory_space<vmem>>, vector<1x2xf32>
    %24 = vector.broadcast %23 : vector<1x2xf32> to vector<8x2xf32>
    %25 = arith.addf %22, %24 : vector<8x2xf32>
    %c0_17 = arith.constant 0 : index
    %c0_18 = arith.constant 0 : index
    %26 = vector.load %arg8[%c0_17, %c0_18] : memref<8x2xf32, #tpu.memory_space<vmem>>, vector<8x2xf32>
    tpu.vector_store %arg8[%c0_17, %c0_18], %25 {strides = array<i32>} : memref<8x2xf32, #tpu.memory_space<vmem>>, vector<8x2xf32>,
    return
  }
  func.func @transform_0(%arg0: i32) -> (i32, i32) {
    %c0_i32 = arith.constant 0 : i32
    %c0_i32_0 = arith.constant 0 : i32
    return %arg0, %c0_i32 : i32, i32
  }
  func.func @transform_1(%arg0: i32) -> (i32, i32) {
    %c0_i32 = arith.constant 0 : i32
    %c0_i32_0 = arith.constant 0 : i32
    %c0_i32_1 = arith.constant 0 : i32
    return %c0_i32, %c0_i32_0 : i32, i32
  }
  func.func @transform_2(%arg0: i32) -> (i32, i32) {
    %c0_i32 = arith.constant 0 : i32
    %c0_i32_0 = arith.constant 0 : i32
    %c0_i32_1 = arith.constant 0 : i32
    return %c0_i32, %c0_i32_0 : i32, i32
  }
  func.func @transform_3(%arg0: i32) -> (i32, i32) {
    %c0_i32 = arith.constant 0 : i32
    %c0_i32_0 = arith.constant 0 : i32
    %c0_i32_1 = arith.constant 0 : i32
    return %c0_i32, %c0_i32_0 : i32, i32
  }
  func.func @transform_4(%arg0: i32) -> (i32, i32) {
    %c0_i32 = arith.constant 0 : i32
    %c0_i32_0 = arith.constant 0 : i32
    %c0_i32_1 = arith.constant 0 : i32
    return %c0_i32, %c0_i32_0 : i32, i32
  }
  func.func @transform_5(%arg0: i32) -> (i32, i32) {
    %c0_i32 = arith.constant 0 : i32
    %c0_i32_0 = arith.constant 0 : i32
    %c0_i32_1 = arith.constant 0 : i32
    return %c0_i32, %c0_i32_0 : i32, i32
  }
  func.func @transform_6(%arg0: i32) -> (i32, i32) {
    %c0_i32 = arith.constant 0 : i32
    %c0_i32_0 = arith.constant 0 : i32
    %c0_i32_1 = arith.constant 0 : i32
    return %c0_i32, %c0_i32_0 : i32, i32
  }
  func.func @transform_7(%arg0: i32) -> (i32, i32) {
    %c0_i32 = arith.constant 0 : i32
    %c0_i32_0 = arith.constant 0 : i32
    return %arg0, %c0_i32 : i32, i32
  }
}

</mosaic_0001>

<bundles_post_ra>
// kernel: network_forward.1
= control target key start
LH: loop header
LB: loop body
LE: loop exit
PB: predicated region body
PF: predicated region fallthrough
CT: control target
= control target key end

     0   :  { %v278_v0 = vmov 0.0   ;;  %vm60_vm0 = vcmask 1041408   ;;  %vm279_vm1 = vmmov 0   ;;  %vm56_vm2 = vcmask 818176   ;;  %s408_s1 = inlined_call_operand.vmem [shape: f32[100,32], index: 1, kind: input, shape index: {}]   ;;  %s409_s0 = inlined_call_operand.vmem [shape: f32[8,100], index: 0, kind: input, shape index: {}]   ;;  %s410_s3 = inlined_call_operand.vmem [shape: f32[32,16], index: 3, kind: input, shape index: {}]   ;;  %s411_s2 = inlined_call_operand.vmem [shape: f32[1,32], index: 2, kind: input, shape index: {}]   ;;  %s412_s5 = inlined_call_operand.vmem [shape: f32[16,2], index: 5, kind: input, shape index: {}]   ;;  %s413_s4 = inlined_call_operand.vmem [shape: f32[1,16], index: 4, kind: input, shape index: {}]   ;;  %s414_s6 = inlined_call_operand.vmem [shape: f32[1,2], index: 6, kind: input, shape index: {}]   ;;  %s415_s7 = inlined_call_operand.vmem [shape: f32[8,2], index: 7, kind: output, shape index: {}]  }
   0x1   :  { %244 = vmatprep.subr.bf16.mxu0 %v278_v0  ;;  %v41_v1 = vld [vmem:[%s408_s1 + $0x60] sm:$0xf]  ;;  %258 = vmatprep.mubr.msk.bf16.mxu0 %vm279_vm1, %v278_v0  ;;  %v39_v3 = vld [vmem:[%s408_s1 + $0x50] sm:$0xff]  ;;  %v40_v4 = vld [vmem:[%s408_s1 + $0x58] sm:$0xff]  ;;  %vm119_vm3 = vcmask 261120   ;;  %vm175_vm4 = vcmask 130048  }
   0x2   :  { %v48_v2 = vpack.c.bf16 %v41_v1, %v41_v1  ;;  %262 = vmatprep.subr.bf16.mxu1 %v278_v0  ;;  %266 = vmatprep.mubr.msk.bf16.mxu1 %vm279_vm1, %v278_v0  ;;  %v47_v6 = vpack.c.bf16 %v40_v4, %v39_v3  ;;  %v37_v7 = vld [vmem:[%s408_s1 + $0x40] sm:$0xff]  ;;  %v38_v8 = vld [vmem:[%s408_s1 + $0x48] sm:$0xff]  ;;  %v35_v10 = vld [vmem:[%s408_s1 + $0x30] sm:$0xff]  ;;  %vm219_vm5 = vcmask 15360  }
   0x3   :  { %v46_v9 = vpack.c.bf16 %v38_v8, %v37_v7  ;;  %v36_v11 = vld [vmem:[%s408_s1 + $0x38] sm:$0xff]  ;;  %v33_v13 = vld [vmem:[%s408_s1 + $0x20] sm:$0xff]  ;;  %v34_v14 = vld [vmem:[%s408_s1 + $0x28] sm:$0xff] }
   0x4   :  { %v62_v5 = vsel %vm60_vm0, %v48_v2, 0  ;;  %v45_v12 = vpack.c.bf16 %v36_v11, %v35_v10  ;;  %v44_v15 = vpack.c.bf16 %v34_v14, %v33_v13  ;;  %v31_v16 = vld [vmem:[%s408_s1 + $0x10] sm:$0xff]  ;;  %v32_v17 = vld [vmem:[%s408_s1 + $0x18] sm:$0xff]  ;;  %v29_v19 = vld [vmem:[%s408_s1] sm:$0xff] }
   0x5   :  { %245 = vmatpush3.bf16.msra.mxu0 %v62_v5  ;;  %v43_v18 = vpack.c.bf16 %v32_v17, %v31_v16  ;;  %v30_v20 = vld [vmem:[%s408_s1 + $0x8] sm:$0xff]  ;;  %v27_v22 = vld [vmem:[%s409_s0] sm:$0xff]  ;;  %v108_v24 = vld [vmem:[%s410_s3 + $0x10] sm:$0xff] }
   0x6   :  { %246 = vmatprep.subr.bf16.mxu0 %v278_v0  ;;  %v42_v21 = vpack.c.bf16 %v30_v20, %v29_v19  ;;  %v28_v23 = vpack.c.bf16 %v27_v22, %v27_v22  ;;  %v109_v25 = vld [vmem:[%s410_s3 + $0x18] sm:$0xff]  ;;  %v106_v27 = vld [vmem:[%s410_s3] sm:$0xff]  ;;  %v107_v28 = vld [vmem:[%s410_s3 + $0x8] sm:$0xff] }
   0x7   :  { %v111_v26 = vpack.c.bf16 %v109_v25, %v108_v24  ;;  %v110_v29 = vpack.c.bf16 %v107_v28, %v106_v27  ;;  %v225_v30 = vld [vmem:[%s411_s2] ss:$0 sm:$0xff]  ;;  %v166_v34 = vld [vmem:[%s412_s5 + $0x8] sm:$0xff] }
   0x8   :  { %v165_v33 = vld [vmem:[%s412_s5] sm:$0xff] }
   0x9   :  { %247 = vmatpush3.bf16.msra.mxu0 %v47_v6  ;;  %263 = vmatpush3.bf16.msra.mxu1 %v111_v26  ;;  %v167_v38 = vpack.c.bf16 %v166_v34, %v165_v33  ;;  %v227_v41 = vld [vmem:[%s413_s4] ss:$0 sm:$0xff] }
   0xa   :  { %248 = vmatprep.subr.bf16.mxu0 %v278_v0  ;;  %264 = vmatprep.subr.bf16.mxu1 %v278_v0  ;;  %v229_v49 = vld [vmem:[%s414_s6] ss:$0 sm:$0xff] }
   0xd   :  { %249 = vmatpush3.bf16.msra.mxu0 %v46_v9  ;;  %265 = vmatpush3.bf16.msra.mxu1 %v110_v29 }
   0xe   :  { %250 = vmatprep.subr.bf16.mxu0 %v278_v0  ;;  %270 = vmatprep.subr.bf16.mxu1 %v278_v0 }
  0x11   :  { %251 = vmatpush3.bf16.msra.mxu0 %v45_v12 }
  0x12   :  { %252 = vmatprep.subr.bf16.mxu0 %v278_v0 }
  0x15   :  { %253 = vmatpush3.bf16.msra.mxu0 %v44_v15 }
  0x16   :  { %254 = vmatprep.subr.bf16.mxu0 %v278_v0 }
  0x19   :  { %255 = vmatpush3.bf16.msra.mxu0 %v43_v18 }
  0x1a   :  { %256 = vmatprep.subr.bf16.mxu0 %v278_v0 }
  0x1d   :  { %257 = vmatpush3.bf16.msra.mxu0 %v42_v21 }
  0x20   :  { %259 = vmatmul.mubr.msk.bf16.vlgmr.msra.gmra.mxu0 %vm56_vm2, %v28_v23 }
  0xe0   :  { %v98_v31 = vpop.f32.mrf.mxu0 }
  0xe1   :  { %v99_v32 = vadd.f32 %v225_v30, %v98_v31 }
  0xe2   :  { %v260_v35 = vpop.f32.mrf.mxu0 }
  0xe3   :  { %v104_v36 = vmax.f32 %v99_v32, 0.0 }
  0xe4   :  { %v101_v37 = vpop.f32.mrf.mxu0 }
  0xe5   :  { %v105_v39 = vpack.c.bf16 %v104_v36, %v104_v36 }
  0xe6   :  { %v261_v40 = vpop.f32.mrf.mxu0 }
  0xe7   :  { %267 = vmatmul.mubr.msk.bf16.vlgmr.msra.gmra.mxu1 %vm119_vm3, %v105_v39 }
  0xe8   :  { %271 = vmatpush3.bf16.msra.mxu1 %v167_v38  ;;  %272 = vmatprep.mubr.msk.bf16.mxu1 %vm279_vm1, %v278_v0 }
 0x1a7   :  { %v157_v42 = vpop.f32.mrf.mxu1 }
 0x1a8   :  { %v158_v43 = vadd.f32 %v227_v41, %v157_v42 }
 0x1a9   :  { %v268_v44 = vpop.f32.mrf.mxu1 }
 0x1aa   :  { %v163_v45 = vmax.f32 %v158_v43, 0.0 }
 0x1ab   :  { %v160_v46 = vpop.f32.mrf.mxu1 }
 0x1ac   :  { %v164_v47 = vpack.c.bf16 %v163_v45, %v163_v45 }
 0x1ad   :  { %v269_v48 = vpop.f32.mrf.mxu1 }
 0x1ae   :  { %273 = vmatmul.mubr.msk.bf16.vlgmr.msra.gmra.mxu1 %vm175_vm4, %v164_v47 }
 0x26e   :  { %v213_v50 = vpop.f32.mrf.mxu1 }
 0x26f   :  { %v214_v51 = vadd.f32 %v229_v49, %v213_v50 }
 0x270   :  { %v274_v52 = vpop.f32.mrf.mxu1 }
 0x271   :  { %220 = vst.msk [vmem:[%s415_s7] sm:$0xff] %vm219_vm5, %v214_v51 }
 0x272   :  { %v216_v53 = vpop.f32.mrf.mxu1 }
 0x274   :  { %v275_v54 = vpop.f32.mrf.mxu1 }

</bundles_post_ra>
